<compile_context>
chip_gen: v5e
topology: v5e:2x2
jax: 0.10.0
libtpu: 0.0.40
codegen_flags: <defaults>
</compile_context>

<pallas_src>
import functools
import math

import jax
import jax.numpy as jnp
from jax import lax
from jax.experimental import pallas as pl
from jax.experimental.pallas import tpu as pltpu


# ------------------------------ kernel helpers -------------------------------

def _dot_t(a, w):
    """a @ w.T without materializing the transpose (contract last dims), f32 acc."""
    return lax.dot_general(a, w, (((1,), (1,)), ((), ())),
                           preferred_element_type=jnp.float32)


def _layernorm(x, gamma, beta, eps):
    mean = jnp.mean(x, axis=-1, keepdims=True)
    xc = x - mean
    var = jnp.mean(xc * xc, axis=-1, keepdims=True)
    return xc * lax.rsqrt(var + eps) * gamma + beta


# ---------------------------------- kernel ------------------------------------

def _attention_block_kernel(q_ref, v_ref,
                            wq_ref, bq_ref, wkv_ref, bkv_ref, wo_ref, bo_ref,
                            g1_ref, be1_ref, g2_ref, be2_ref,
                            o_ref, *, nbatch, nhead, head_dim, eps, approx_recip):
    f32 = jnp.float32
    rows, e = q_ref.shape                 # rows = nbatch * L, batch-major row order
    l_len = rows // nbatch
    s_len = v_ref.shape[0] // nbatch

    q_in = q_ref[...]                     # MXU dtype (bf16 by default)
    v_in = v_ref[...]
    md = q_in.dtype

    # Fused input projections: one K=E matmul for Q, one for packed K/V.
    # Weights are consumed in their natural (out, in) layout (no transpose).
    qp = _dot_t(q_in, wq_ref[...]) + bq_ref[...].astype(f32)      # (rows, E)  f32
    kv = _dot_t(v_in, wkv_ref[...]) + bkv_ref[...].astype(f32)    # (rows, 2E) f32

    # Scaled dot-product attention: one leading-batch einsum pair per head.
    # Softmax is left unnormalized; normalization happens after the PV matmul
    # with an EUP reciprocal on the (b, L, 1) row sums.
    # TODO(synk): key_padding_mask / attn_mask not implemented (module defaults are None).
    qs = qp * (1.0 / math.sqrt(head_dim))                          # fold 1/sqrt(hd) once
    head_outs = []
    for h in range(nhead):
        ksl = slice(h * head_dim, (h + 1) * head_dim)              # K part of packed slab
        vsl = slice(e + h * head_dim, e + (h + 1) * head_dim)      # V part of packed slab
        q3 = qs[:, ksl].reshape(nbatch, l_len, head_dim).astype(md)
        k3 = kv[:, ksl].reshape(nbatch, s_len, head_dim).astype(md)
        v3 = kv[:, vsl].reshape(nbatch, s_len, head_dim).astype(md)
        s = jnp.einsum("bqd,bkd->bqk", q3, k3, preferred_element_type=f32)
        s = s - jnp.max(s, axis=-1, keepdims=True)
        p = jnp.exp(s)                                             # unnormalized, f32
        inv = pl.reciprocal(jnp.sum(p, axis=-1, keepdims=True), approx=approx_recip)
        o = jnp.einsum("bqk,bkd->bqd", p.astype(md), v3, preferred_element_type=f32)
        head_outs.append((o * inv).reshape(rows, head_dim))
    attn = jnp.concatenate(head_outs, axis=-1)                     # (rows, E) f32
    attn = _dot_t(attn.astype(md), wo_ref[...]) + bo_ref[...].astype(f32)

    # Residual + LayerNorm1.
    # TODO(synk): dropout layers are identity here (eval mode); training RNG masking
    # is not implemented.
    x = v_in.astype(f32) + attn
    x = _layernorm(x, g1_ref[...].astype(f32), be1_ref[...].astype(f32), eps)

    # The reference's FFN output (linear2(relu(linear1(x)))) is never added back
    # (`v = v + dropout2(v)` adds v, not v2), so the FFN is omitted entirely and
    # its weights are not kernel inputs (no DMA, no VMEM, no MXU work).

    # Second residual + LayerNorm2, exactly as written in the reference module.
    x = x + x
    x = _layernorm(x, g2_ref[...].astype(f32), be2_ref[...].astype(f32), eps)
    o_ref[...] = x.astype(o_ref.dtype)


# --------------------------------- wrapper ------------------------------------

def attention_forward(q, v, params, *, nhead, eps=1e-5,
                      mxu_dtype=jnp.bfloat16, batch_tile=None, approx_recip=True):
    """Pallas implementation of Attention.forward(q, v) in eval mode.

    q: (L, N, E), v: (S, N, E) -- seq-first like PyTorch nn.MultiheadAttention.
    Returns (L, N, E) in q's original dtype.
    """
    orig_dtype = q.dtype
    L, N, E = q.shape
    S, N2, E2 = v.shape
    assert N == N2 and E == E2, "q/v batch and embed dims must match"
    assert L == S, "residual `v + attn_out` requires matching sequence lengths"
    assert E % nhead == 0
    head_dim = E // nhead

    if batch_tile is None:
        batch_tile = N                   # fold all batches into a single grid step
    assert N % batch_tile == 0
    n_steps = N // batch_tile            # >= 2 parallel steps on larger batches (v7x)

    md = jnp.dtype(mxu_dtype)
    f32 = jnp.float32

    # Batch-major, batch-contiguous 2-D slabs: row = n*L + l.  These transposes are
    # wrapper-level XLA copies; they let the kernel use plain row-blocked 2-D
    # BlockSpecs and leading-batch einsums (the safest/fastest Mosaic layout).
    q2 = jnp.transpose(q, (1, 0, 2)).reshape(N * L, E).astype(md)
    v2 = jnp.transpose(v, (1, 0, 2)).reshape(N * S, E).astype(md)

    # Pack K/V projections: a single (S*N, E) x (2E, E)^T matmul in the kernel.
    wq = params["w_q"].astype(md)
    wkv = jnp.concatenate([params["w_k"], params["w_v"]], axis=0).astype(md)  # (2E, E)
    wo = params["w_o"].astype(md)
    bq = params["b_q"].astype(f32)
    bkv = jnp.concatenate([params["b_k"], params["b_v"]], axis=1).astype(f32)  # (1, 2E)
    bo = params["b_o"].astype(f32)
    g1, be1 = params["g1"].astype(f32), params["be1"].astype(f32)
    g2, be2 = params["g2"].astype(f32), params["be2"].astype(f32)

    weights = [wq, bq, wkv, bkv, wo, bo, g1, be1, g2, be2]

    def row_spec(rows_per_step):
        return pl.BlockSpec((rows_per_step, E), lambda b: (b, 0))

    def rep_spec(shape):   # grid-invariant weights: same (full) block every step
        nd = len(shape)
        return pl.BlockSpec(shape, lambda b, _nd=nd: (0,) * _nd)

    kernel = functools.partial(
        _attention_block_kernel, nbatch=batch_tile, nhead=nhead,
        head_dim=head_dim, eps=eps, approx_recip=approx_recip)

    out = pl.pallas_call(
        kernel,
        out_shape=jax.ShapeDtypeStruct((N * L, E), orig_dtype),
        grid_spec=pltpu.PrefetchScalarGridSpec(
            num_scalar_prefetch=0,
            grid=(n_steps,),
            in_specs=[row_spec(batch_tile * L), row_spec(batch_tile * S)]
                     + [rep_spec(w.shape) for w in weights],
            out_specs=row_spec(batch_tile * L),
        ),
        compiler_params=pltpu.CompilerParams(
            dimension_semantics=("parallel",)),
    )(q2, v2, *weights)

    return jnp.transpose(out.reshape(N, L, E), (1, 0, 2))   # back to seq-first (L, N, E)


# -------------------------------- reference -----------------------------------

def _reference(q, v, p, *, nhead, eps=1e-5):
    """Pure-JAX transcription of the PyTorch forward (eval mode) for validation."""
    L, N, E = q.shape
    S = v.shape[0]
    hd = E // nhead

    def lin(x, w, b):   # x: (T, N, in), w: (out, in), b: (1, out)
        return jnp.einsum("tni,oi->tno", x, w) + b.reshape(1, 1, -1)

    Q = lin(q, p["w_q"], p["b_q"])
    K = lin(v, p["w_k"], p["b_k"])
    V = lin(v, p["w_v"], p["b_v"])
    Qh = Q.reshape(L, N, nhead, hd).transpose(1, 2, 0, 3)
    Kh = K.reshape(S, N, nhead, hd).transpose(1, 2, 0, 3)
    Vh = V.reshape(S, N, nhead, hd).transpose(1, 2, 0, 3)
    s = jnp.einsum("bhld,bhsd->bhls", Qh, Kh) / math.sqrt(hd)
    a = jax.nn.softmax(s, axis=-1)
    o = jnp.einsum("bhls,bhsd->bhld", a, Vh)
    o = o.transpose(2, 0, 1, 3).reshape(L, N, E)
    attn = lin(o, p["w_o"], p["b_o"])

    def ln(x, g, b):
        m = x.mean(-1, keepdims=True)
        xc = x - m
        var = (xc * xc).mean(-1, keepdims=True)
        return xc * lax.rsqrt(var + eps) * g.reshape(1, 1, -1) + b.reshape(1, 1, -1)

    x = v + attn                       # v + dropout(v2), dropout identity in eval
    x = ln(x, p["g1"], p["be1"])
    # FFN output (linear2(relu(linear1(x)))) is unused in the reference forward.
    x = x + x                          # v + dropout2(v), dropout identity in eval
    x = ln(x, p["g2"], p["be2"])
    return x


def _make_params(key, d_model):
    ks = jax.random.split(key, 12)
    E = d_model

    def normal(k, shape, scale):
        return jax.random.normal(k, shape, jnp.float32) * scale

    # linear1/linear2 (FFN) parameters exist in the PyTorch module but cannot
    # affect its forward output (their result is discarded), so they are omitted.
    return {
        "w_q": normal(ks[0], (E, E), 1.0 / math.sqrt(E)),
        "w_k": normal(ks[1], (E, E), 1.0 / math.sqrt(E)),
        "w_v": normal(ks[2], (E, E), 1.0 / math.sqrt(E)),
        "b_q": normal(ks[3], (1, E), 0.02),
        "b_k": normal(ks[4], (1, E), 0.02),
        "b_v": normal(ks[5], (1, E), 0.02),
        "w_o": normal(ks[6], (E, E), 1.0 / math.sqrt(E)),
        "b_o": normal(ks[7], (1, E), 0.02),
        "g1": 1.0 + normal(ks[8], (1, E), 0.05),
        "be1": normal(ks[9], (1, E), 0.05),
        "g2": 1.0 + normal(ks[10], (1, E), 0.05),
        "be2": normal(ks[11], (1, E), 0.05),
    }


# ----------------------------------- main --------------------------------------

if __name__ == "__main__":
    d_model, nhead = 32, 4
    seq, batch = 8, 2

    key = jax.random.PRNGKey(0)
    kq, kv, kp = jax.random.split(key, 3)
    q = jax.random.normal(kq, (seq, batch, d_model), jnp.float32)
    v = jax.random.normal(kv, (seq, batch, d_model), jnp.float32)
    params = _make_params(kp, d_model)

    y_ref = _reference(q, v, params, nhead=nhead)

    # Tight logic check: f32 MXU operands + exact reciprocal.
    y32 = attention_forward(q, v, params, nhead=nhead,
                            mxu_dtype=jnp.float32, approx_recip=False)
    y32 = jax.block_until_ready(y32)
    assert y32.shape == (seq, batch, d_model)
    assert jnp.allclose(y32, y_ref, atol=2e-4, rtol=2e-4), "f32 mismatch vs reference"

    # Default perf config: bf16 MXU operands + approximate EUP reciprocal.
    y = attention_forward(q, v, params, nhead=nhead)
    y = jax.block_until_ready(y)
    assert y.shape == (seq, batch, d_model)
    assert jnp.allclose(y, y_ref, atol=1e-1, rtol=1e-1), "bf16 mismatch vs reference"

    print("KERNEL_OK")
</pallas_src>

<mosaic_0001>
module attributes {stable_mosaic.version = 11 : i64} {
  func.func @_attention_block_kernel(%arg0: i32, %arg1: memref<16x32xf32, #tpu.memory_space<vmem>>, %arg2: memref<16x32xf32, #tpu.memory_space<vmem>>, %arg3: memref<32x32xf32, #tpu.memory_space<vmem>>, %arg4: memref<1x32xf32, #tpu.memory_space<vmem>>, %arg5: memref<64x32xf32, #tpu.memory_space<vmem>>, %arg6: memref<1x64xf32, #tpu.memory_space<vmem>>, %arg7: memref<32x32xf32, #tpu.memory_space<vmem>>, %arg8: memref<1x32xf32, #tpu.memory_space<vmem>>, %arg9: memref<1x32xf32, #tpu.memory_space<vmem>>, %arg10: memref<1x32xf32, #tpu.memory_space<vmem>>, %arg11: memref<1x32xf32, #tpu.memory_space<vmem>>, %arg12: memref<1x32xf32, #tpu.memory_space<vmem>>, %arg13: memref<16x32xf32, #tpu.memory_space<vmem>>) attributes {dimension_semantics = [#tpu.dimension_semantics<parallel>], iteration_bounds = array<i64: 1>, scalar_prefetch = 0 : i64, scratch_operands = 0 : i64, tpu.core_type = #tpu.core_type<tc>, window_params = [{transform_indices = @transform_0, window_bounds = array<i64: 16, 32>}, {transform_indices = @transform_1, window_bounds = array<i64: 16, 32>}, {pipeline_mode = #tpu.pipeline_mode<synchronous>, transform_indices = @transform_2, window_bounds = array<i64: 32, 32>}, {pipeline_mode = #tpu.pipeline_mode<synchronous>, transform_indices = @transform_3, window_bounds = array<i64: 1, 32>}, {pipeline_mode = #tpu.pipeline_mode<synchronous>, transform_indices = @transform_4, window_bounds = array<i64: 64, 32>}, {pipeline_mode = #tpu.pipeline_mode<synchronous>, transform_indices = @transform_5, window_bounds = array<i64: 1, 64>}, {pipeline_mode = #tpu.pipeline_mode<synchronous>, transform_indices = @transform_6, window_bounds = array<i64: 32, 32>}, {pipeline_mode = #tpu.pipeline_mode<synchronous>, transform_indices = @transform_7, window_bounds = array<i64: 1, 32>}, {pipeline_mode = #tpu.pipeline_mode<synchronous>, transform_indices = @transform_8, window_bounds = array<i64: 1, 32>}, {pipeline_mode = #tpu.pipeline_mode<synchronous>, transform_indices = @transform_9, window_bounds = array<i64: 1, 32>}, {pipeline_mode = #tpu.pipeline_mode<synchronous>, transform_indices = @transform_10, window_bounds = array<i64: 1, 32>}, {pipeline_mode = #tpu.pipeline_mode<synchronous>, transform_indices = @transform_11, window_bounds = array<i64: 1, 32>}, {transform_indices = @transform_12, window_bounds = array<i64: 16, 32>}]} {
    %c0 = arith.constant 0 : index
    %c0_0 = arith.constant 0 : index
    %0 = vector.load %arg1[%c0, %c0_0] : memref<16x32xf32, #tpu.memory_space<vmem>>, vector<16x32xf32>
    %c0_1 = arith.constant 0 : index
    %c0_2 = arith.constant 0 : index
    %1 = vector.load %arg2[%c0_1, %c0_2] : memref<16x32xf32, #tpu.memory_space<vmem>>, vector<16x32xf32>
    %c0_3 = arith.constant 0 : index
    %c0_4 = arith.constant 0 : index
    %2 = vector.load %arg3[%c0_3, %c0_4] : memref<32x32xf32, #tpu.memory_space<vmem>>, vector<32x32xf32>
    %cst = arith.constant dense<0.000000e+00> : vector<16x32xf32>
    %3 = tpu.matmul %0, %2, %cst {dimension_numbers = #tpu.dot_dimension_numbers<[1], [1], [0], [0], [0, 0, 1, 0], [], []>} : vector<16x32xf32>, vector<32x32xf32>, vector<16x32xf32> -> vector<16x32xf32>
    %c0_5 = arith.constant 0 : index
    %c0_6 = arith.constant 0 : index
    %4 = vector.load %arg4[%c0_5, %c0_6] : memref<1x32xf32, #tpu.memory_space<vmem>>, vector<1x32xf32>
    %5 = vector.broadcast %4 : vector<1x32xf32> to vector<16x32xf32>
    %6 = arith.addf %3, %5 : vector<16x32xf32>
    %c0_7 = arith.constant 0 : index
    %c0_8 = arith.constant 0 : index
    %7 = vector.load %arg5[%c0_7, %c0_8] : memref<64x32xf32, #tpu.memory_space<vmem>>, vector<64x32xf32>
    %cst_9 = arith.constant dense<0.000000e+00> : vector<16x64xf32>
    %8 = tpu.matmul %1, %7, %cst_9 {dimension_numbers = #tpu.dot_dimension_numbers<[1], [1], [0], [0], [0, 0, 1, 0], [], []>} : vector<16x32xf32>, vector<64x32xf32>, vector<16x64xf32> -> vector<16x64xf32>
    %c0_10 = arith.constant 0 : index
    %c0_11 = arith.constant 0 : index
    %9 = vector.load %arg6[%c0_10, %c0_11] : memref<1x64xf32, #tpu.memory_space<vmem>>, vector<1x64xf32>
    %10 = vector.broadcast %9 : vector<1x64xf32> to vector<16x64xf32>
    %11 = arith.addf %8, %10 : vector<16x64xf32>
    %cst_12 = arith.constant 0.353553385 : f32
    %12 = vector.broadcast %cst_12 : f32 to vector<16x32xf32>
    %13 = arith.mulf %6, %12 : vector<16x32xf32>
    %14 = vector.extract_strided_slice %13 {offsets = [0, 0], sizes = [16, 8], strides = [1, 1]} : vector<16x32xf32> to vector<16x8xf32>
    %15 = vector.shape_cast %14 : vector<16x8xf32> to vector<2x8x8xf32>
    %16 = vector.extract_strided_slice %11 {offsets = [0, 0], sizes = [16, 8], strides = [1, 1]} : vector<16x64xf32> to vector<16x8xf32>
    %17 = vector.shape_cast %16 : vector<16x8xf32> to vector<2x8x8xf32>
    %18 = vector.extract_strided_slice %11 {offsets = [0, 32], sizes = [16, 8], strides = [1, 1]} : vector<16x64xf32> to vector<16x8xf32>
    %19 = vector.shape_cast %18 : vector<16x8xf32> to vector<2x8x8xf32>
    "tpu.trace_start"() <{level = 10 : i32, message = "bqd,bkd->bqk"}> : () -> ()
    %cst_13 = arith.constant dense<0.000000e+00> : vector<2x8x8xf32>
    %20 = tpu.matmul %15, %17, %cst_13 {dimension_numbers = #tpu.dot_dimension_numbers<[2], [2], [1], [1], [0, 0, 0, 1, 1, 1], [0], [0]>} : vector<2x8x8xf32>, vector<2x8x8xf32>, vector<2x8x8xf32> -> vector<2x8x8xf32>
    "tpu.trace_stop"() : () -> ()
    %cst_14 = arith.constant dense<0xFF800000> : vector<2x8xf32>
    %21 = vector.multi_reduction <maximumf>, %20, %cst_14 [2] : vector<2x8x8xf32> to vector<2x8xf32>
    %22 = vector.shape_cast %21 : vector<2x8xf32> to vector<2x8x1xf32>
    %23 = vector.broadcast %22 : vector<2x8x1xf32> to vector<2x8x8xf32>
    %24 = arith.subf %20, %23 : vector<2x8x8xf32>
    %25 = math.exp %24 : vector<2x8x8xf32>
    %cst_15 = arith.constant dense<0.000000e+00> : vector<2x8xf32>
    %26 = vector.multi_reduction <add>, %25, %cst_15 [2] : vector<2x8x8xf32> to vector<2x8xf32>
    %27 = vector.shape_cast %26 : vector<2x8xf32> to vector<2x8x1xf32>
    %28 = tpu.reciprocal %27 : vector<2x8x1xf32> -> vector<2x8x1xf32>
    "tpu.trace_start"() <{level = 10 : i32, message = "bqk,bkd->bqd"}> : () -> ()
    %cst_16 = arith.constant dense<0.000000e+00> : vector<2x8x8xf32>
    %29 = tpu.matmul %25, %19, %cst_16 {dimension_numbers = #tpu.dot_dimension_numbers<[2], [1], [1], [2], [0, 0, 0, 1, 1, 2], [0], [0]>} : vector<2x8x8xf32>, vector<2x8x8xf32>, vector<2x8x8xf32> -> vector<2x8x8xf32>
    "tpu.trace_stop"() : () -> ()
    %30 = vector.broadcast %28 : vector<2x8x1xf32> to vector<2x8x8xf32>
    %31 = arith.mulf %29, %30 : vector<2x8x8xf32>
    %32 = vector.shape_cast %31 : vector<2x8x8xf32> to vector<16x8xf32>
    %33 = vector.extract_strided_slice %13 {offsets = [0, 8], sizes = [16, 8], strides = [1, 1]} : vector<16x32xf32> to vector<16x8xf32>
    %34 = vector.shape_cast %33 : vector<16x8xf32> to vector<2x8x8xf32>
    %35 = vector.extract_strided_slice %11 {offsets = [0, 8], sizes = [16, 8], strides = [1, 1]} : vector<16x64xf32> to vector<16x8xf32>
    %36 = vector.shape_cast %35 : vector<16x8xf32> to vector<2x8x8xf32>
    %37 = vector.extract_strided_slice %11 {offsets = [0, 40], sizes = [16, 8], strides = [1, 1]} : vector<16x64xf32> to vector<16x8xf32>
    %38 = vector.shape_cast %37 : vector<16x8xf32> to vector<2x8x8xf32>
    "tpu.trace_start"() <{level = 10 : i32, message = "bqd,bkd->bqk"}> : () -> ()
    %cst_17 = arith.constant dense<0.000000e+00> : vector<2x8x8xf32>
    %39 = tpu.matmul %34, %36, %cst_17 {dimension_numbers = #tpu.dot_dimension_numbers<[2], [2], [1], [1], [0, 0, 0, 1, 1, 1], [0], [0]>} : vector<2x8x8xf32>, vector<2x8x8xf32>, vector<2x8x8xf32> -> vector<2x8x8xf32>
    "tpu.trace_stop"() : () -> ()
    %cst_18 = arith.constant dense<0xFF800000> : vector<2x8xf32>
    %40 = vector.multi_reduction <maximumf>, %39, %cst_18 [2] : vector<2x8x8xf32> to vector<2x8xf32>
    %41 = vector.shape_cast %40 : vector<2x8xf32> to vector<2x8x1xf32>
    %42 = vector.broadcast %41 : vector<2x8x1xf32> to vector<2x8x8xf32>
    %43 = arith.subf %39, %42 : vector<2x8x8xf32>
    %44 = math.exp %43 : vector<2x8x8xf32>
    %cst_19 = arith.constant dense<0.000000e+00> : vector<2x8xf32>
    %45 = vector.multi_reduction <add>, %44, %cst_19 [2] : vector<2x8x8xf32> to vector<2x8xf32>
    %46 = vector.shape_cast %45 : vector<2x8xf32> to vector<2x8x1xf32>
    %47 = tpu.reciprocal %46 : vector<2x8x1xf32> -> vector<2x8x1xf32>
    "tpu.trace_start"() <{level = 10 : i32, message = "bqk,bkd->bqd"}> : () -> ()
    %cst_20 = arith.constant dense<0.000000e+00> : vector<2x8x8xf32>
    %48 = tpu.matmul %44, %38, %cst_20 {dimension_numbers = #tpu.dot_dimension_numbers<[2], [1], [1], [2], [0, 0, 0, 1, 1, 2], [0], [0]>} : vector<2x8x8xf32>, vector<2x8x8xf32>, vector<2x8x8xf32> -> vector<2x8x8xf32>
    "tpu.trace_stop"() : () -> ()
    %49 = vector.broadcast %47 : vector<2x8x1xf32> to vector<2x8x8xf32>
    %50 = arith.mulf %48, %49 : vector<2x8x8xf32>
    %51 = vector.shape_cast %50 : vector<2x8x8xf32> to vector<16x8xf32>
    %52 = vector.extract_strided_slice %13 {offsets = [0, 16], sizes = [16, 8], strides = [1, 1]} : vector<16x32xf32> to vector<16x8xf32>
    %53 = vector.shape_cast %52 : vector<16x8xf32> to vector<2x8x8xf32>
    %54 = vector.extract_strided_slice %11 {offsets = [0, 16], sizes = [16, 8], strides = [1, 1]} : vector<16x64xf32> to vector<16x8xf32>
    %55 = vector.shape_cast %54 : vector<16x8xf32> to vector<2x8x8xf32>
    %56 = vector.extract_strided_slice %11 {offsets = [0, 48], sizes = [16, 8], strides = [1, 1]} : vector<16x64xf32> to vector<16x8xf32>
    %57 = vector.shape_cast %56 : vector<16x8xf32> to vector<2x8x8xf32>
    "tpu.trace_start"() <{level = 10 : i32, message = "bqd,bkd->bqk"}> : () -> ()
    %cst_21 = arith.constant dense<0.000000e+00> : vector<2x8x8xf32>
    %58 = tpu.matmul %53, %55, %cst_21 {dimension_numbers = #tpu.dot_dimension_numbers<[2], [2], [1], [1], [0, 0, 0, 1, 1, 1], [0], [0]>} : vector<2x8x8xf32>, vector<2x8x8xf32>, vector<2x8x8xf32> -> vector<2x8x8xf32>
    "tpu.trace_stop"() : () -> ()
    %cst_22 = arith.constant dense<0xFF800000> : vector<2x8xf32>
    %59 = vector.multi_reduction <maximumf>, %58, %cst_22 [2] : vector<2x8x8xf32> to vector<2x8xf32>
    %60 = vector.shape_cast %59 : vector<2x8xf32> to vector<2x8x1xf32>
    %61 = vector.broadcast %60 : vector<2x8x1xf32> to vector<2x8x8xf32>
    %62 = arith.subf %58, %61 : vector<2x8x8xf32>
    %63 = math.exp %62 : vector<2x8x8xf32>
    %cst_23 = arith.constant dense<0.000000e+00> : vector<2x8xf32>
    %64 = vector.multi_reduction <add>, %63, %cst_23 [2] : vector<2x8x8xf32> to vector<2x8xf32>
    %65 = vector.shape_cast %64 : vector<2x8xf32> to vector<2x8x1xf32>
    %66 = tpu.reciprocal %65 : vector<2x8x1xf32> -> vector<2x8x1xf32>
    "tpu.trace_start"() <{level = 10 : i32, message = "bqk,bkd->bqd"}> : () -> ()
    %cst_24 = arith.constant dense<0.000000e+00> : vector<2x8x8xf32>
    %67 = tpu.matmul %63, %57, %cst_24 {dimension_numbers = #tpu.dot_dimension_numbers<[2], [1], [1], [2], [0, 0, 0, 1, 1, 2], [0], [0]>} : vector<2x8x8xf32>, vector<2x8x8xf32>, vector<2x8x8xf32> -> vector<2x8x8xf32>
    "tpu.trace_stop"() : () -> ()
    %68 = vector.broadcast %66 : vector<2x8x1xf32> to vector<2x8x8xf32>
    %69 = arith.mulf %67, %68 : vector<2x8x8xf32>
    %70 = vector.shape_cast %69 : vector<2x8x8xf32> to vector<16x8xf32>
    %71 = vector.extract_strided_slice %13 {offsets = [0, 24], sizes = [16, 8], strides = [1, 1]} : vector<16x32xf32> to vector<16x8xf32>
    %72 = vector.shape_cast %71 : vector<16x8xf32> to vector<2x8x8xf32>
    %73 = vector.extract_strided_slice %11 {offsets = [0, 24], sizes = [16, 8], strides = [1, 1]} : vector<16x64xf32> to vector<16x8xf32>
    %74 = vector.shape_cast %73 : vector<16x8xf32> to vector<2x8x8xf32>
    %75 = vector.extract_strided_slice %11 {offsets = [0, 56], sizes = [16, 8], strides = [1, 1]} : vector<16x64xf32> to vector<16x8xf32>
    %76 = vector.shape_cast %75 : vector<16x8xf32> to vector<2x8x8xf32>
    "tpu.trace_start"() <{level = 10 : i32, message = "bqd,bkd->bqk"}> : () -> ()
    %cst_25 = arith.constant dense<0.000000e+00> : vector<2x8x8xf32>
    %77 = tpu.matmul %72, %74, %cst_25 {dimension_numbers = #tpu.dot_dimension_numbers<[2], [2], [1], [1], [0, 0, 0, 1, 1, 1], [0], [0]>} : vector<2x8x8xf32>, vector<2x8x8xf32>, vector<2x8x8xf32> -> vector<2x8x8xf32>
    "tpu.trace_stop"() : () -> ()
    %cst_26 = arith.constant dense<0xFF800000> : vector<2x8xf32>
    %78 = vector.multi_reduction <maximumf>, %77, %cst_26 [2] : vector<2x8x8xf32> to vector<2x8xf32>
    %79 = vector.shape_cast %78 : vector<2x8xf32> to vector<2x8x1xf32>
    %80 = vector.broadcast %79 : vector<2x8x1xf32> to vector<2x8x8xf32>
    %81 = arith.subf %77, %80 : vector<2x8x8xf32>
    %82 = math.exp %81 : vector<2x8x8xf32>
    %cst_27 = arith.constant dense<0.000000e+00> : vector<2x8xf32>
    %83 = vector.multi_reduction <add>, %82, %cst_27 [2] : vector<2x8x8xf32> to vector<2x8xf32>
    %84 = vector.shape_cast %83 : vector<2x8xf32> to vector<2x8x1xf32>
    %85 = tpu.reciprocal %84 : vector<2x8x1xf32> -> vector<2x8x1xf32>
    "tpu.trace_start"() <{level = 10 : i32, message = "bqk,bkd->bqd"}> : () -> ()
    %cst_28 = arith.constant dense<0.000000e+00> : vector<2x8x8xf32>
    %86 = tpu.matmul %82, %76, %cst_28 {dimension_numbers = #tpu.dot_dimension_numbers<[2], [1], [1], [2], [0, 0, 0, 1, 1, 2], [0], [0]>} : vector<2x8x8xf32>, vector<2x8x8xf32>, vector<2x8x8xf32> -> vector<2x8x8xf32>
    "tpu.trace_stop"() : () -> ()
    %87 = vector.broadcast %85 : vector<2x8x1xf32> to vector<2x8x8xf32>
    %88 = arith.mulf %86, %87 : vector<2x8x8xf32>
    %89 = vector.shape_cast %88 : vector<2x8x8xf32> to vector<16x8xf32>
    %90 = tpu.concatenate %32, %51, %70, %89 in 1 : vector<16x8xf32>, vector<16x8xf32>, vector<16x8xf32>, vector<16x8xf32> -> vector<16x32xf32>
    %c0_29 = arith.constant 0 : index
    %c0_30 = arith.constant 0 : index
    %91 = vector.load %arg7[%c0_29, %c0_30] : memref<32x32xf32, #tpu.memory_space<vmem>>, vector<32x32xf32>
    %cst_31 = arith.constant dense<0.000000e+00> : vector<16x32xf32>
    %92 = tpu.matmul %90, %91, %cst_31 {dimension_numbers = #tpu.dot_dimension_numbers<[1], [1], [0], [0], [0, 0, 1, 0], [], []>} : vector<16x32xf32>, vector<32x32xf32>, vector<16x32xf32> -> vector<16x32xf32>
    %c0_32 = arith.constant 0 : index
    %c0_33 = arith.constant 0 : index
    %93 = vector.load %arg8[%c0_32, %c0_33] : memref<1x32xf32, #tpu.memory_space<vmem>>, vector<1x32xf32>
    %94 = vector.broadcast %93 : vector<1x32xf32> to vector<16x32xf32>
    %95 = arith.addf %92, %94 : vector<16x32xf32>
    %96 = arith.addf %1, %95 : vector<16x32xf32>
    %c0_34 = arith.constant 0 : index
    %c0_35 = arith.constant 0 : index
    %97 = vector.load %arg9[%c0_34, %c0_35] : memref<1x32xf32, #tpu.memory_space<vmem>>, vector<1x32xf32>
    %c0_36 = arith.constant 0 : index
    %c0_37 = arith.constant 0 : index
    %98 = vector.load %arg10[%c0_36, %c0_37] : memref<1x32xf32, #tpu.memory_space<vmem>>, vector<1x32xf32>
    %cst_38 = arith.constant dense<0.000000e+00> : vector<16xf32>
    %99 = vector.multi_reduction <add>, %96, %cst_38 [1] : vector<16x32xf32> to vector<16xf32>
    %100 = vector.shape_cast %99 : vector<16xf32> to vector<16x1xf32>
    %cst_39 = arith.constant 3.200000e+01 : f32
    %101 = vector.broadcast %cst_39 : f32 to vector<16x1xf32>
    %102 = arith.divf %100, %101 : vector<16x1xf32>
    %103 = vector.broadcast %102 : vector<16x1xf32> to vector<16x32xf32>
    %104 = arith.subf %96, %103 : vector<16x32xf32>
    %105 = arith.mulf %104, %104 : vector<16x32xf32>
    %cst_40 = arith.constant dense<0.000000e+00> : vector<16xf32>
    %106 = vector.multi_reduction <add>, %105, %cst_40 [1] : vector<16x32xf32> to vector<16xf32>
    %107 = vector.shape_cast %106 : vector<16xf32> to vector<16x1xf32>
    %cst_41 = arith.constant 3.200000e+01 : f32
    %108 = vector.broadcast %cst_41 : f32 to vector<16x1xf32>
    %109 = arith.divf %107, %108 : vector<16x1xf32>
    %cst_42 = arith.constant 9.99999974E-6 : f32
    %110 = vector.broadcast %cst_42 : f32 to vector<16x1xf32>
    %111 = arith.addf %109, %110 : vector<16x1xf32>
    %112 = math.rsqrt %111 : vector<16x1xf32>
    %113 = vector.broadcast %112 : vector<16x1xf32> to vector<16x32xf32>
    %114 = arith.mulf %104, %113 : vector<16x32xf32>
    %115 = vector.broadcast %97 : vector<1x32xf32> to vector<16x32xf32>
    %116 = arith.mulf %114, %115 : vector<16x32xf32>
    %117 = vector.broadcast %98 : vector<1x32xf32> to vector<16x32xf32>
    %118 = arith.addf %116, %117 : vector<16x32xf32>
    %119 = arith.addf %118, %118 : vector<16x32xf32>
    %c0_43 = arith.constant 0 : index
    %c0_44 = arith.constant 0 : index
    %120 = vector.load %arg11[%c0_43, %c0_44] : memref<1x32xf32, #tpu.memory_space<vmem>>, vector<1x32xf32>
    %c0_45 = arith.constant 0 : index
    %c0_46 = arith.constant 0 : index
    %121 = vector.load %arg12[%c0_45, %c0_46] : memref<1x32xf32, #tpu.memory_space<vmem>>, vector<1x32xf32>
    %cst_47 = arith.constant dense<0.000000e+00> : vector<16xf32>
    %122 = vector.multi_reduction <add>, %119, %cst_47 [1] : vector<16x32xf32> to vector<16xf32>
    %123 = vector.shape_cast %122 : vector<16xf32> to vector<16x1xf32>
    %cst_48 = arith.constant 3.200000e+01 : f32
    %124 = vector.broadcast %cst_48 : f32 to vector<16x1xf32>
    %125 = arith.divf %123, %124 : vector<16x1xf32>
    %126 = vector.broadcast %125 : vector<16x1xf32> to vector<16x32xf32>
    %127 = arith.subf %119, %126 : vector<16x32xf32>
    %128 = arith.mulf %127, %127 : vector<16x32xf32>
    %cst_49 = arith.constant dense<0.000000e+00> : vector<16xf32>
    %129 = vector.multi_reduction <add>, %128, %cst_49 [1] : vector<16x32xf32> to vector<16xf32>
    %130 = vector.shape_cast %129 : vector<16xf32> to vector<16x1xf32>
    %cst_50 = arith.constant 3.200000e+01 : f32
    %131 = vector.broadcast %cst_50 : f32 to vector<16x1xf32>
    %132 = arith.divf %130, %131 : vector<16x1xf32>
    %cst_51 = arith.constant 9.99999974E-6 : f32
    %133 = vector.broadcast %cst_51 : f32 to vector<16x1xf32>
    %134 = arith.addf %132, %133 : vector<16x1xf32>
    %135 = math.rsqrt %134 : vector<16x1xf32>
    %136 = vector.broadcast %135 : vector<16x1xf32> to vector<16x32xf32>
    %137 = arith.mulf %127, %136 : vector<16x32xf32>
    %138 = vector.broadcast %120 : vector<1x32xf32> to vector<16x32xf32>
    %139 = arith.mulf %137, %138 : vector<16x32xf32>
    %140 = vector.broadcast %121 : vector<1x32xf32> to vector<16x32xf32>
    %141 = arith.addf %139, %140 : vector<16x32xf32>
    %c0_52 = arith.constant 0 : index
    %c0_53 = arith.constant 0 : index
    %142 = vector.load %arg13[%c0_52, %c0_53] : memref<16x32xf32, #tpu.memory_space<vmem>>, vector<16x32xf32>
    tpu.vector_store %arg13[%c0_52, %c0_53], %141 {strides = array<i32>} : memref<16x32xf32, #tpu.memory_space<vmem>>, vector<16x32xf32>,
    return
  }
  func.func @transform_0(%arg0: i32) -> (i32, i32) {
    %c0_i32 = arith.constant 0 : i32
    %c0_i32_0 = arith.constant 0 : i32
    return %arg0, %c0_i32 : i32, i32
  }
  func.func @transform_1(%arg0: i32) -> (i32, i32) {
    %c0_i32 = arith.constant 0 : i32
    %c0_i32_0 = arith.constant 0 : i32
    return %arg0, %c0_i32 : i32, i32
  }
  func.func @transform_2(%arg0: i32) -> (i32, i32) {
    %c0_i32 = arith.constant 0 : i32
    %c0_i32_0 = arith.constant 0 : i32
    %c0_i32_1 = arith.constant 0 : i32
    return %c0_i32, %c0_i32_0 : i32, i32
  }
  func.func @transform_3(%arg0: i32) -> (i32, i32) {
    %c0_i32 = arith.constant 0 : i32
    %c0_i32_0 = arith.constant 0 : i32
    %c0_i32_1 = arith.constant 0 : i32
    return %c0_i32, %c0_i32_0 : i32, i32
  }
  func.func @transform_4(%arg0: i32) -> (i32, i32) {
    %c0_i32 = arith.constant 0 : i32
    %c0_i32_0 = arith.constant 0 : i32
    %c0_i32_1 = arith.constant 0 : i32
    return %c0_i32, %c0_i32_0 : i32, i32
  }
  func.func @transform_5(%arg0: i32) -> (i32, i32) {
    %c0_i32 = arith.constant 0 : i32
    %c0_i32_0 = arith.constant 0 : i32
    %c0_i32_1 = arith.constant 0 : i32
    return %c0_i32, %c0_i32_0 : i32, i32
  }
  func.func @transform_6(%arg0: i32) -> (i32, i32) {
    %c0_i32 = arith.constant 0 : i32
    %c0_i32_0 = arith.constant 0 : i32
    %c0_i32_1 = arith.constant 0 : i32
    return %c0_i32, %c0_i32_0 : i32, i32
  }
  func.func @transform_7(%arg0: i32) -> (i32, i32) {
    %c0_i32 = arith.constant 0 : i32
    %c0_i32_0 = arith.constant 0 : i32
    %c0_i32_1 = arith.constant 0 : i32
    return %c0_i32, %c0_i32_0 : i32, i32
  }
  func.func @transform_8(%arg0: i32) -> (i32, i32) {
    %c0_i32 = arith.constant 0 : i32
    %c0_i32_0 = arith.constant 0 : i32
    %c0_i32_1 = arith.constant 0 : i32
    return %c0_i32, %c0_i32_0 : i32, i32
  }
  func.func @transform_9(%arg0: i32) -> (i32, i32) {
    %c0_i32 = arith.constant 0 : i32
    %c0_i32_0 = arith.constant 0 : i32
    %c0_i32_1 = arith.constant 0 : i32
    return %c0_i32, %c0_i32_0 : i32, i32
  }
  func.func @transform_10(%arg0: i32) -> (i32, i32) {
    %c0_i32 = arith.constant 0 : i32
    %c0_i32_0 = arith.constant 0 : i32
    %c0_i32_1 = arith.constant 0 : i32
    return %c0_i32, %c0_i32_0 : i32, i32
  }
  func.func @transform_11(%arg0: i32) -> (i32, i32) {
    %c0_i32 = arith.constant 0 : i32
    %c0_i32_0 = arith.constant 0 : i32
    %c0_i32_1 = arith.constant 0 : i32
    return %c0_i32, %c0_i32_0 : i32, i32
  }
  func.func @transform_12(%arg0: i32) -> (i32, i32) {
    %c0_i32 = arith.constant 0 : i32
    %c0_i32_0 = arith.constant 0 : i32
    return %arg0, %c0_i32 : i32, i32
  }
}

</mosaic_0001>

<bundles_post_ra>
// kernel: tpu_custom_call.1
= control target key start
LH: loop header
LB: loop body
LE: loop exit
PB: predicated region body
PF: predicated region fallthrough
CT: control target
= control target key end

     0   :  { %vm54_vm0 = vcmask 261120   ;;  %s1471_s0 = inlined_call_operand.vmem [shape: f32[16,32], index: 0, kind: input, shape index: {}]   ;;  %s1472_s1 = inlined_call_operand.vmem [shape: f32[16,32], index: 1, kind: input, shape index: {}]   ;;  %s1473_s2 = inlined_call_operand.vmem [shape: f32[32,32], index: 2, kind: input, shape index: {}]   ;;  %s1474_s3 = inlined_call_operand.vmem [shape: f32[1,32], index: 3, kind: input, shape index: {}]   ;;  %s1475_s4 = inlined_call_operand.vmem [shape: f32[64,32], index: 4, kind: input, shape index: {}]   ;;  %s1476_s5 = inlined_call_operand.vmem [shape: f32[1,64], index: 5, kind: input, shape index: {}]   ;;  %s1477_s6 = inlined_call_operand.vmem [shape: f32[32,32], index: 6, kind: input, shape index: {}]   ;;  %s1478_s7 = inlined_call_operand.vmem [shape: f32[1,32], index: 7, kind: input, shape index: {}]   ;;  %s1479_s8 = inlined_call_operand.vmem [shape: f32[1,32], index: 8, kind: input, shape index: {}]   ;;  %s1480_s9 = inlined_call_operand.vmem [shape: f32[1,32], index: 9, kind: input, shape index: {}]   ;;  %s1481_s10 = inlined_call_operand.vmem [shape: f32[1,32], index: 10, kind: input, shape index: {}]   ;;  %s1482_s11 = inlined_call_operand.vmem [shape: f32[1,32], index: 11, kind: input, shape index: {}]   ;;  %s1483_s12 = inlined_call_operand.hbm [shape: f32[16,32], index: 12, kind: output, shape index: {}]  }
   0x1   :  { %v103_v0 = vld [vmem:[%s1475_s4 + $0x38] sm:$0xff]  ;;  %v102_v2 = vld [vmem:[%s1475_s4 + $0x30] sm:$0xff]  ;;  %v101_v4 = vld [vmem:[%s1475_s4 + $0x28] sm:$0xff] }
   0x2   :  { %1014 = vmatpush.xpose.msk.msra.mxu1 %vm54_vm0, %v103_v0  ;;  %v49_v1 = vld [vmem:[%s1473_s2 + $0x18] sm:$0xff]  ;;  %v48_v3 = vld [vmem:[%s1473_s2 + $0x10] sm:$0xff]  ;;  %v47_v5 = vld [vmem:[%s1473_s2 + $0x8] sm:$0xff] }
   0x3   :  { %1008 = vmatpush.xpose.msk.msra.mxu0 %vm54_vm0, %v49_v1 }
   0x6   :  { %1015 = vmatpush.xpose.msk.msra.mxu1 %vm54_vm0, %v102_v2 }
   0x7   :  { %1009 = vmatpush.xpose.msk.msra.mxu0 %vm54_vm0, %v48_v3 }
   0x8   :  { %17 = vsyncpa [#allocation3], 0  ;;  %v100_v6 = vld [vmem:[%s1475_s4 + $0x20] sm:$0xff]  ;;  %v99_v8 = vld [vmem:[%s1475_s4 + $0x18] sm:$0xff]  ;;  %s1142_s16 = smov 120   ;;  %vm163_vm1 = vcmask 64512  }
   0x9   :  { %v46_v7 = vld [vmem:[%s1473_s2] sm:$0xff]  ;;  %v98_v10 = vld [vmem:[%s1475_s4 + $0x10] sm:$0xff]  ;;  %v97_v11 = vld [vmem:[%s1475_s4 + $0x8] sm:$0xff]  ;;  %s1146_s19 = smov 80   ;;  %s1147_s20 = smov 104  }
   0xa   :  { %1016 = vmatpush.xpose.msk.msra.mxu1 %vm54_vm0, %v101_v4  ;;  %v42_v9 = vld [vmem:[%s1471_s0] sm:$0xff]  ;;  %v43_v12 = vld [vmem:[%s1471_s0 + $0x8] sm:$0xff]  ;;  %s1148_s21 = smov 72   ;;  %s1149_s22 = smov 8  }
   0xb   :  { %1010 = vmatpush.xpose.msk.msra.mxu0 %vm54_vm0, %v47_v5  ;;  %v96_v13 = vld [vmem:[%s1475_s4] sm:$0xff]  ;;  %v1286_v15 = vld [vmem:[%s1472_s1 + $0x8] sm:$0xff]  ;;  %s1150_s23 = smov 16   ;;  %s1151_s24 = smov 24  }
   0xc   :  { %v1279_v14 = vld [vmem:[%s1472_s1] sm:$0xff]  ;;  %s1143_s1 = smov 96  }
   0xd   :  { %v1067_v16 = vld [vmem:[%s1474_s3] ss:$0 sm:$0xff]  ;;  %s1144_s3 = smov 112  }
   0xe   :  { %1017 = vmatpush.xpose.msk.msra.mxu1 %vm54_vm0, %v100_v6  ;;  %v1068_v20 = vld [vmem:[%s1476_s5] ss:$0 sm:$0xff]  ;;  %s1145_s5 = smov 88  }
   0xf   :  { %1011 = vmatpush.xpose.msk.msra.mxu0 %vm54_vm0, %v46_v7 }
  0x12   :  { %1018 = vmatpush.xpose.msk.msra.mxu1 %vm54_vm0, %v99_v8  ;;  %1012 = vmatmul.msk.f32.vlgmr.msra.gmra.mxu0 %vm54_vm0, %v42_v9 }
  0x16   :  { %1019 = vmatpush.xpose.msk.msra.mxu1 %vm54_vm0, %v98_v10 }
  0x1a   :  { %1020 = vmatpush.xpose.msk.msra.mxu1 %vm54_vm0, %v97_v11  ;;  %1013 = vmatmul.msk.f32.gmra.mxu0 %vm54_vm0, %v43_v12 }
  0x1e   :  { %1021 = vmatpush.xpose.msk.msra.mxu1 %vm54_vm0, %v96_v13 }
  0x21   :  { %1022 = vmatmul.msk.f32.vlgmr.msra.gmra.mxu1 %vm54_vm0, %v1279_v14 }
  0x29   :  { %1023 = vmatmul.msk.f32.gmra.mxu1 %vm54_vm0, %v1286_v15 }
  0x8f   :  { %v90_v17 = vpop.f32.mrf.mxu0 }
  0x90   :  { %v91_v18 = vadd.f32 %v1067_v16, %v90_v17 }
  0x92   :  { %v1293_v19 = vmul.f32 0.35355338, %v91_v18 }
  0x94   :  { %316 = vrot.lane.b32.xlu1 %v1293_v19, %s1142_s16 }
  0x97   :  { %v93_v23 = vpop.f32.mrf.mxu0 }
  0x98   :  { %v94_v24 = vadd.f32 %v1067_v16, %v93_v23 }
  0x9a   :  { %v1310_v27 = vmul.f32 0.35355338, %v94_v24 }
  0x9e   :  { %v155_v21 = vpop.f32.mrf.mxu1 }
  0x9f   :  { %v1300_v22 = vadd.f32 %v1068_v20, %v155_v21 }
  0xa1   :  { %318 = vrot.lane.b32.xlu0 %v1300_v22, %s1142_s16  ;;  %1024 = vmatpush.xpose.msk.msra.mxu3 %vm163_vm1, %v1300_v22 }
  0xa4   :  { %1025 = vmatmul.msk.f32.vlgmr.msra.gmra.mxu3 %vm163_vm1, %v1293_v19 }
  0xa6   :  { %v158_v25 = vpop.f32.mrf.mxu1 }
  0xa7   :  { %v1308_v26 = vadd.f32 %v1068_v20, %v158_v25 }
  0xa9   :  { %1026 = vmatpush.xpose.msk.msrb.mxu3 %vm163_vm1, %v1308_v26  ;;  %288 = vrot.lane.b32.xlu1 %v1308_v26, %s1143_s1 }
  0xac   :  { %1027 = vmatmul.msk.f32.vlgmr.msrb.gmra.mxu3 %vm163_vm1, %v1310_v27 }
  0xb1   :  { %344 = vrot.lane.b32.xlu1 %v1310_v27, %s1142_s16 }
  0xb9   :  { %262 = vrot.lane.b32.xlu1 %v1300_v22, %s1143_s1 }
  0xc1   :  { %472 = vrot.lane.b32.xlu1 %v1293_v19, %s1144_s3 }
  0xc9   :  { %418 = vrot.lane.b32.xlu1 %v1300_v22, %s1145_s5 }
 0x106   :  { %v317_v28 = vpop.permute.xlu1 %316 }
 0x113   :  { %v319_v29 = vpop.permute.xlu0 %318 }
 0x114   :  { %1030 = vmatpush.xpose.msk.msra.mxu2 %vm163_vm1, %v319_v29 }
 0x117   :  { %1031 = vmatmul.msk.f32.vlgmr.msra.gmra.mxu2 %vm163_vm1, %v317_v28 }
 0x11b   :  { %v289_v30 = vpop.permute.xlu1 %288 }
 0x11c   :  { %309 = vmatpush.msra.mxu3 %v289_v30 }
 0x123   :  { %v345_v31 = vpop.permute.xlu1 %344 }
 0x127   :  { %v187_v32 = vpop.f32.mrf.mxu3 }
 0x128   :  { %v216_v33 = vsel %vm163_vm1, %v187_v32, -inf }
 0x129   :  { %217 = vmax.xlane.f32.xlu2 %v216_v33 }
 0x12b   :  { %v263_v34 = vpop.permute.xlu1 %262 }
 0x12c   :  { %283 = vmatpush.msrb.mxu0 %v263_v34 }
 0x12f   :  { %v213_v35 = vpop.f32.mrf.mxu3 }
 0x130   :  { %v219_v36 = vsel %vm163_vm1, %v213_v35, -inf }
 0x131   :  { %220 = vmax.xlane.f32.xlu0 %v219_v36 }
 0x133   :  { %v473_v37 = vpop.permute.xlu1 %472 }
 0x13b   :  { %v419_v38 = vpop.permute.xlu1 %418 }
 0x13c   :  { %439 = vmatpush.msrb.mxu2 %v419_v38 }
 0x141   :  { %346 = vrot.lane.b32.xlu2 %v1308_v26, %s1142_s16 }
 0x145   :  { %474 = vrot.lane.b32.xlu0 %v1300_v22, %s1144_s3 }
 0x149   :  { %502 = vrot.lane.b32.xlu2 %v1308_v26, %s1144_s3 }
 0x14d   :  { %444 = vrot.lane.b32.xlu0 %v1308_v26, %s1145_s5  ;;  %s1154_s5 = smov 128  }
 0x155   :  { %574 = vrot.lane.b32.xlu0 %v1300_v22, %s1146_s19 }
 0x19a   :  { %v341_v39 = vpop.f32.mrf.mxu2 }
 0x19b   :  { %v372_v40 = vsel %vm163_vm1, %v341_v39, -inf }
 0x19c   :  { %373 = vmax.xlane.f32.xlu2 %v372_v40  ;;  %v218_v41 = vpop.xlane.xlu2 %217 }
 0x19d   :  { %v222_v42 = vsub.f32 %v187_v32, %v218_v41 }
 0x19f   :  { %v224_v43 = vmul.f32 1.442695, %v222_v42 }
 0x1a1   :  { %1074 = vpow2.f32 %v224_v43 }
 0x1a4   :  { %v347_v44 = vpop.permute.xlu2 %346  ;;  %v221_v45 = vpop.xlane.xlu0 %220 }
 0x1a5   :  { %v223_v46 = vsub.f32 %v213_v35, %v221_v45  ;;  %1032 = vmatpush.xpose.msk.msrb.mxu3 %vm163_vm1, %v347_v44 }
 0x1a7   :  { %v1338_v47 = vpop.eup %1074  ;;  %v226_v48 = vmul.f32 1.442695, %v223_v46 }
 0x1a8   :  { %1028 = vmatmul.msk.f32.vlgmr.msrb.gmra.mxu0 %vm163_vm1, %v1338_v47 }
 0x1a9   :  { %1076 = vpow2.f32 %v226_v48 }
 0x1ac   :  { %v503_v49 = vpop.permute.xlu2 %502 }
 0x1ad   :  { %1038 = vmatpush.xpose.msk.msra.mxu2 %vm163_vm1, %v503_v49 }
 0x1af   :  { %v1343_v50 = vpop.eup %1076 }
 0x1b0   :  { %1029 = vmatmul.msk.f32.vlgmr.msra.gmra.mxu3 %vm163_vm1, %v1343_v50 }
 0x1b4   :  { %630 = vrot.lane.b32.xlu2 %v1300_v22, %s1147_s20 }
 0x1b7   :  { %v475_v51 = vpop.permute.xlu0 %474 }
 0x1b8   :  { %1033 = vmatmul.msk.f32.vlgmr.msrb.gmra.mxu3 %vm163_vm1, %v345_v31  ;;  %1036 = vmatpush.xpose.msk.msra.mxu0 %vm163_vm1, %v475_v51 }
 0x1bb   :  { %1037 = vmatmul.msk.f32.vlgmr.msra.gmra.mxu0 %vm163_vm1, %v473_v37 }
 0x1bc   :  { %628 = vrot.lane.b32.xlu2 %v1293_v19, %s1147_s20 }
 0x1bf   :  { %v445_v52 = vpop.permute.xlu0 %444 }
 0x1c0   :  { %465 = vmatpush.msra.mxu3 %v445_v52 }
 0x1c4   :  { %656 = vrot.lane.b32.xlu2 %v1310_v27, %s1147_s20 }
 0x1c7   :  { %v575_v53 = vpop.permute.xlu0 %574 }
 0x1c8   :  { %595 = vmatpush.msrb.mxu3 %v575_v53 }
 0x1cc   :  { %600 = vrot.lane.b32.xlu2 %v1308_v26, %s1146_s19 }
 0x20f   :  { %v374_v54 = vpop.xlane.xlu2 %373 }
 0x210   :  { %v378_v55 = vsub.f32 %v341_v39, %v374_v54 }
 0x212   :  { %v380_v56 = vmul.f32 1.442695, %v378_v55 }
 0x214   :  { %1078 = vpow2.f32 %v380_v56 }
 0x217   :  { %v631_v57 = vpop.permute.xlu2 %630 }
 0x21a   :  { %v1079_v58 = vpop.eup %1078 }
 0x21b   :  { %1034 = vmatmul.msk.f32.vlgmr.msrb.gmra.mxu2 %vm163_vm1, %v1079_v58 }
 0x21c   :  { %1042 = vmatpush.xpose.msk.msrb.mxu2 %vm163_vm1, %v631_v57 }
 0x21f   :  { %v629_v59 = vpop.permute.xlu2 %628 }
 0x225   :  { %v1360_v62 = vpop.f32.mrf.mxu0 }
 0x227   :  { %v657_v60 = vpop.permute.xlu2 %656 }
 0x22f   :  { %v601_v61 = vpop.permute.xlu2 %600 }
 0x230   :  { %621 = vmatpush.msrb.mxu0 %v601_v61 }
 0x233   :  { %v1362_v63 = vpop.f32.mrf.mxu3 }
 0x238   :  { %v497_v0 = vpop.f32.mrf.mxu0 }
 0x239   :  { %v528_v1 = vsel %vm163_vm1, %v497_v0, -inf }
 0x23a   :  { %529 = vmax.xlane.f32.xlu1 %v528_v1 }
 0x23b   :  { %v369_v2 = vpop.f32.mrf.mxu3 }
 0x23c   :  { %v375_v3 = vsel %vm163_vm1, %v369_v2, -inf }
 0x23d   :  { %376 = vmax.xlane.f32.xlu0 %v375_v3 }
 0x251   :  { %658 = vrot.lane.b32.xlu0 %v1308_v26, %s1147_s20 }
 0x253   :  { %500 = vrot.lane.b32.xlu1 %v1310_v27, %s1144_s3  ;;  %v384_v27 = vsel %vm163_vm1, %v1079_v58, 0.0 }
 0x29e   :  { %v441_v17 = vpop.f32.mrf.mxu2 }
 0x2ad   :  { %v530_v6 = vpop.xlane.xlu1 %529 }
 0x2ae   :  { %v534_v8 = vsub.f32 %v497_v0, %v530_v6 }
 0x2b0   :  { %v377_v4 = vpop.xlane.xlu0 %376  ;;  %v536_v9 = vmul.f32 1.442695, %v534_v8 }
 0x2b1   :  { %v379_v5 = vsub.f32 %v369_v2, %v377_v4 }
 0x2b3   :  { %v382_v7 = vmul.f32 1.442695, %v379_v5 }
 0x2b5   :  { %1080 = vpow2.f32 %v382_v7 }
 0x2b6   :  { %1082 = vpow2.f32 %v536_v9 }
 0x2bb   :  { %v1081_v10 = vpop.eup %1080 }
 0x2bc   :  { %1035 = vmatmul.msk.f32.vlgmr.msra.gmra.mxu3 %vm163_vm1, %v1081_v10  ;;  %v1083_v11 = vpop.eup %1082  ;;  %v387_v29 = vsel %vm163_vm1, %v1081_v10, 0.0 }
 0x2bd   :  { %v540_v28 = vsel %vm163_vm1, %v1083_v11, 0.0 }
 0x2c3   :  { %v659_v12 = vpop.permute.xlu0 %658 }
 0x2c4   :  { %1040 = vmatmul.msk.f32.vlgmr.msrb.gmra.mxu3 %vm163_vm1, %v1083_v11 }
 0x2c5   :  { %1044 = vmatpush.xpose.msk.msra.mxu3 %vm163_vm1, %v659_v12  ;;  %v501_v13 = vpop.permute.xlu1 %500 }
 0x2c6   :  { %1039 = vmatmul.msk.f32.vlgmr.msra.gmra.mxu2 %vm163_vm1, %v501_v13 }
 0x2cc   :  { %1045 = vmatmul.msk.f32.vlgmr.msra.gmra.mxu3 %vm163_vm1, %v657_v60  ;;  %v231_v60 = vsel %vm163_vm1, %v1343_v50, 0.0 }
 0x2ce   :  { %1043 = vmatmul.msk.f32.vlgmr.msrb.gmra.mxu2 %vm163_vm1, %v629_v59  ;;  %v228_v59 = vsel %vm163_vm1, %v1338_v47, 0.0 }
 0x33f   :  { %v1376_v16 = vpop.f32.mrf.mxu3 }
 0x347   :  { %v1378_v18 = vpop.f32.mrf.mxu3 }
 0x349   :  { %v525_v19 = vpop.f32.mrf.mxu2 }
 0x34a   :  { %v531_v20 = vsel %vm163_vm1, %v525_v19, -inf }
 0x34b   :  { %532 = vmax.xlane.f32.xlu0 %v531_v20 }
 0x34f   :  { %v681_v21 = vpop.f32.mrf.mxu3 }
 0x350   :  { %v687_v23 = vsel %vm163_vm1, %v681_v21, -inf }
 0x351   :  { %v653_v24 = vpop.f32.mrf.mxu2  ;;  %688 = vmax.xlane.f32.xlu2 %v687_v23 }
 0x352   :  { %v684_v25 = vsel %vm163_vm1, %v653_v24, -inf }
 0x353   :  { %685 = vmax.xlane.f32.xlu1 %v684_v25 }
 0x359   :  { %385 = vadd.xlane.f32.xlu2 %v384_v27 }
 0x35f   :  { %730 = vrot.lane.b32.xlu0 %v1300_v22, %s1148_s21 }
 0x36c   :  { %756 = vrot.lane.b32.xlu1 %v1308_v26, %s1148_s21 }
 0x389   :  { %541 = vadd.xlane.f32.xlu0 %v540_v28 }
 0x396   :  { %388 = vadd.xlane.f32.xlu1 %v387_v29 }
 0x3be   :  { %v533_v30 = vpop.xlane.xlu0 %532 }
 0x3bf   :  { %v535_v31 = vsub.f32 %v525_v19, %v533_v30 }
 0x3c1   :  { %v538_v32 = vmul.f32 1.442695, %v535_v31 }
 0x3c3   :  { %1084 = vpow2.f32 %v538_v32 }
 0x3c4   :  { %v689_v33 = vpop.xlane.xlu2 %688 }
 0x3c5   :  { %v691_v38 = vsub.f32 %v681_v21, %v689_v33 }
 0x3c6   :  { %v686_v34 = vpop.xlane.xlu1 %685 }
 0x3c7   :  { %v690_v35 = vsub.f32 %v653_v24, %v686_v34  ;;  %v694_v43 = vmul.f32 1.442695, %v691_v38 }
 0x3c9   :  { %v1085_v36 = vpop.eup %1084  ;;  %v692_v37 = vmul.f32 1.442695, %v690_v35 }
 0x3ca   :  { %1041 = vmatmul.msk.f32.vlgmr.msrb.gmra.mxu0 %vm163_vm1, %v1085_v36  ;;  %v543_v49 = vsel %vm163_vm1, %v1085_v36, 0.0 }
 0x3cb   :  { %1086 = vpow2.f32 %v692_v37 }
 0x3cc   :  { %v386_v22 = vpop.xlane.xlu2 %385 }
 0x3cd   :  { %1088 = vrcp.f32 %v386_v22  ;;  %v401_v45 = vand.u32 2147483648, %v386_v22  ;;  %v399_v48 = vand.u32 2147483647, %v386_v22  ;;  %vm395_vm3 = vweird.f32 %v386_v22 }
 0x3ce   :  { %1090 = vpow2.f32 %v694_v43 }
 0x3cf   :  { %v402_v52 = vor.u32 1.1754944e-38, %v401_v45  ;;  %vm400_vm5 = vcmp.eq.f32.partialorder %v399_v48, 8.507059e+37 }
 0x3d1   :  { %v1087_v26 = vpop.eup %1086  ;;  %v731_v39 = vpop.permute.xlu0 %730 }
 0x3d2   :  { %751 = vmatpush.msra.mxu0 %v731_v39  ;;  %v696_v40 = vsel %vm163_vm1, %v1087_v26, 0.0 }
 0x3d3   :  { %v1089_v41 = vpop.eup %1088  ;;  %697 = vadd.xlane.f32.xlu2 %v696_v40  ;;  %1046 = vmatmul.msk.f32.vlgmr.msra.gmra.mxu0 %vm163_vm1, %v1087_v26 }
 0x3d4   :  { %v391_v42 = vmul.f32 %v1089_v41, %v386_v22  ;;  %vm396_vm2 = vweird.f32 %v1089_v41  ;;  %v1091_v57 = vpop.eup %1090 }
 0x3d5   :  { %vm397_vm4 = vmor %vm395_vm3, %vm396_vm2  ;;  %v699_v58 = vsel %vm163_vm1, %v1091_v57, 0.0 }
 0x3d6   :  { %v392_v44 = vsub.f32 1.0, %v391_v42 }
 0x3d8   :  { %v393_v46 = vmul.f32 %v1089_v41, %v392_v44 }
 0x3da   :  { %v394_v51 = vadd.f32 %v1089_v41, %v393_v46 }
 0x3db   :  { %544 = vadd.xlane.f32.xlu2 %v543_v49 }
 0x3dc   :  { %v398_v53 = vsel %vm397_vm4, %v1089_v41, %v394_v51 }
 0x3dd   :  { %v403_v54 = vsel %vm400_vm5, %v402_v52, %v398_v53 }
 0x3de   :  { %v757_v55 = vpop.permute.xlu1 %756  ;;  %v470_v56 = vmul.f32 %v441_v17, %v403_v54 }
 0x3df   :  { %777 = vmatpush.msrb.mxu1 %v757_v55 }
 0x3e0   :  { %1047 = vmatmul.msk.f32.vlgmr.msrb.gmra.mxu1 %vm163_vm1, %v1091_v57  ;;  %786 = vrot.lane.b32.xlu0 %v470_v56, %s1149_s22 }
 0x3e3   :  { %700 = vadd.xlane.f32.xlu2 %v699_v58 }
 0x3eb   :  { %229 = vadd.xlane.f32.xlu2 %v228_v59 }
 0x3f3   :  { %232 = vadd.xlane.f32.xlu2 %v231_v60 }
 0x3fc   :  { %v542_v61 = vpop.xlane.xlu0 %541 }
 0x3fd   :  { %1092 = vrcp.f32 %v542_v61  ;;  %v557_v3 = vand.u32 2147483648, %v542_v61  ;;  %v555_v5 = vand.u32 2147483647, %v542_v61  ;;  %vm551_vm7 = vweird.f32 %v542_v61 }
 0x3ff   :  { %v558_v8 = vor.u32 1.1754944e-38, %v557_v3  ;;  %vm556_vm9 = vcmp.eq.f32.partialorder %v555_v5, 8.507059e+37  ;;  %v818_v3 = vld [vmem:[%s1477_s6 + $0x10] sm:$0xff]  ;;  %v817_v5 = vld [vmem:[%s1477_s6 + $0x8] sm:$0xff] }
 0x403   :  { %v1093_v0 = vpop.eup %1092 }
 0x404   :  { %v547_v1 = vmul.f32 %v1093_v0, %v542_v61  ;;  %vm552_vm6 = vweird.f32 %v1093_v0 }
 0x405   :  { %vm553_vm8 = vmor %vm551_vm7, %vm552_vm6 }
 0x406   :  { %v548_v2 = vsub.f32 1.0, %v547_v1 }
 0x408   :  { %v549_v4 = vmul.f32 %v1093_v0, %v548_v2  ;;  %v819_v2 = vld [vmem:[%s1477_s6 + $0x18] sm:$0xff] }
 0x409   :  { %v389_v6 = vpop.xlane.xlu1 %388  ;;  %1048 = vmatpush.xpose.msk.msra.mxu2 %vm54_vm0, %v819_v2 }
 0x40a   :  { %1094 = vrcp.f32 %v389_v6  ;;  %v550_v7 = vadd.f32 %v1093_v0, %v549_v4  ;;  %v415_v13 = vand.u32 2147483648, %v389_v6  ;;  %v413_v19 = vand.u32 2147483647, %v389_v6 }
 0x40b   :  { %vm409_vm11 = vweird.f32 %v389_v6 }
 0x40c   :  { %v554_v47 = vsel %vm553_vm8, %v1093_v0, %v550_v7  ;;  %v416_v21 = vor.u32 1.1754944e-38, %v415_v13  ;;  %vm414_vm13 = vcmp.eq.f32.partialorder %v413_v19, 8.507059e+37 }
 0x40d   :  { %v559_v9 = vsel %vm556_vm9, %v558_v8, %v554_v47  ;;  %1049 = vmatpush.xpose.msk.msra.mxu2 %vm54_vm0, %v818_v3 }
 0x40e   :  { %v626_v50 = vmul.f32 %v1378_v18, %v559_v9 }
 0x410   :  { %v1095_v10 = vpop.eup %1094  ;;  %794 = vrot.lane.b32.xlu2 %v626_v50, %s1150_s23 }
 0x411   :  { %v405_v11 = vmul.f32 %v1095_v10, %v389_v6  ;;  %vm410_vm10 = vweird.f32 %v1095_v10  ;;  %1050 = vmatpush.xpose.msk.msra.mxu2 %vm54_vm0, %v817_v5  ;;  %v816_v6 = vld [vmem:[%s1477_s6] sm:$0xff] }
 0x412   :  { %vm411_vm12 = vmor %vm409_vm11, %vm410_vm10 }
 0x413   :  { %v406_v12 = vsub.f32 1.0, %v405_v11 }
 0x415   :  { %v407_v17 = vmul.f32 %v1095_v10, %v406_v12  ;;  %1051 = vmatpush.xpose.msk.msra.mxu2 %vm54_vm0, %v816_v6 }
 0x417   :  { %v408_v20 = vadd.f32 %v1095_v10, %v407_v17 }
 0x419   :  { %v412_v23 = vsel %vm411_vm12, %v1095_v10, %v408_v20 }
 0x41a   :  { %v417_v24 = vsel %vm414_vm13, %v416_v21, %v412_v23 }
 0x41b   :  { %v471_v25 = vmul.f32 %v1376_v16, %v417_v24 }
 0x41d   :  { %788 = vrot.lane.b32.xlu0 %v471_v25, %s1149_s22 }
 0x446   :  { %v698_v18 = vpop.xlane.xlu2 %697 }
 0x447   :  { %1096 = vrcp.f32 %v698_v18  ;;  %v623_v28 = vpop.f32.mrf.mxu0  ;;  %v713_v32 = vand.u32 2147483648, %v698_v18  ;;  %v711_v34 = vand.u32 2147483647, %v698_v18  ;;  %vm707_vm15 = vweird.f32 %v698_v18 }
 0x449   :  { %v714_v37 = vor.u32 1.1754944e-38, %v713_v32  ;;  %vm712_vm3 = vcmp.eq.f32.partialorder %v711_v34, 8.507059e+37 }
 0x44d   :  { %v1097_v27 = vpop.eup %1096 }
 0x44e   :  { %v703_v29 = vmul.f32 %v1097_v27, %v698_v18  ;;  %v545_v30 = vpop.xlane.xlu2 %544  ;;  %vm708_vm14 = vweird.f32 %v1097_v27 }
 0x44f   :  { %1098 = vrcp.f32 %v545_v30  ;;  %vm709_vm2 = vmor %vm707_vm15, %vm708_vm14  ;;  %v571_v43 = vand.u32 2147483648, %v545_v30  ;;  %v569_v44 = vand.u32 2147483647, %v545_v30  ;;  %vm565_vm5 = vweird.f32 %v545_v30 }
 0x450   :  { %v704_v31 = vsub.f32 1.0, %v703_v29  ;;  %v753_v39 = vpop.f32.mrf.mxu0 }
 0x451   :  { %v572_v48 = vor.u32 1.1754944e-38, %v571_v43  ;;  %vm570_vm7 = vcmp.eq.f32.partialorder %v569_v44, 8.507059e+37 }
 0x452   :  { %v705_v33 = vmul.f32 %v1097_v27, %v704_v31  ;;  %v787_v25 = vpop.permute.xlu0 %786 }
 0x454   :  { %v706_v35 = vadd.f32 %v1097_v27, %v705_v33 }
 0x455   :  { %v1099_v36 = vpop.eup %1098 }
 0x456   :  { %v561_v16 = vmul.f32 %v1099_v36, %v545_v30  ;;  %v710_v22 = vsel %vm709_vm2, %v1097_v27, %v706_v35  ;;  %v701_v26 = vpop.xlane.xlu2 %700  ;;  %vm566_vm4 = vweird.f32 %v1099_v36  ;;  %vm810_vm2 = vcmask 130048  }
 0x457   :  { %v715_v38 = vsel %vm712_vm3, %v714_v37, %v710_v22  ;;  %1100 = vrcp.f32 %v701_v26  ;;  %vm567_vm6 = vmor %vm565_vm5, %vm566_vm4  ;;  %v727_v54 = vand.u32 2147483648, %v701_v26  ;;  %v725_v57 = vand.u32 2147483647, %v701_v26 }
 0x458   :  { %v562_v40 = vsub.f32 1.0, %v561_v16  ;;  %v782_v41 = vmul.f32 %v753_v39, %v715_v38  ;;  %vm721_vm9 = vweird.f32 %v701_v26  ;;  %vm813_vm3 = vcmask 195584  }
 0x459   :  { %v728_v59 = vor.u32 1.1754944e-38, %v727_v54  ;;  %vm726_vm11 = vcmp.eq.f32.partialorder %v725_v57, 8.507059e+37 }
 0x45a   :  { %v563_v42 = vmul.f32 %v1099_v36, %v562_v40  ;;  %802 = vrot.lane.b32.xlu1 %v782_v41, %s1151_s24  ;;  %v1069_v41 = vld [vmem:[%s1478_s7] ss:$0 sm:$0xff] }
 0x45c   :  { %v564_v45 = vadd.f32 %v1099_v36, %v563_v42 }
 0x45d   :  { %v1101_v46 = vpop.eup %1100  ;;  %v779_v0 = vpop.f32.mrf.mxu1 }
 0x45e   :  { %v717_v49 = vmul.f32 %v1101_v46, %v701_v26  ;;  %v568_v51 = vsel %vm567_vm6, %v1099_v36, %v564_v45  ;;  %vm722_vm8 = vweird.f32 %v1101_v46  ;;  %v230_v4 = vpop.xlane.xlu2 %229 }
 0x45f   :  { %v573_v53 = vsel %vm570_vm7, %v572_v48, %v568_v51  ;;  %vm723_vm10 = vmor %vm721_vm9, %vm722_vm8  ;;  %1102 = vrcp.f32 %v230_v4  ;;  %v245_v11 = vand.u32 2147483648, %v230_v4  ;;  %vm239_vm13 = vweird.f32 %v230_v4 }
 0x460   :  { %v718_v52 = vsub.f32 1.0, %v717_v49  ;;  %v627_v55 = vmul.f32 %v623_v28, %v573_v53  ;;  %v243_v12 = vand.u32 2147483647, %v230_v4  ;;  %v1152_v51 = vmov 32.0  }
 0x461   :  { %v246_v19 = vor.u32 1.1754944e-38, %v245_v11 }
 0x462   :  { %v719_v56 = vmul.f32 %v1101_v46, %v718_v52  ;;  %796 = vrot.lane.b32.xlu2 %v627_v55, %s1150_s23  ;;  %vm244_vm15 = vcmp.eq.f32.partialorder %v243_v12, 8.507059e+37 }
 0x464   :  { %v720_v58 = vadd.f32 %v1101_v46, %v719_v56 }
 0x465   :  { %v1103_v7 = vpop.eup %1102 }
 0x466   :  { %v724_v60 = vsel %vm723_vm10, %v1101_v46, %v720_v58  ;;  %v235_v8 = vmul.f32 %v1103_v7, %v230_v4  ;;  %v233_v50 = vpop.xlane.xlu2 %232  ;;  %vm240_vm12 = vweird.f32 %v1103_v7 }
 0x467   :  { %v729_v61 = vsel %vm726_vm11, %v728_v59, %v724_v60  ;;  %1104 = vrcp.f32 %v233_v50  ;;  %vm241_vm14 = vmor %vm239_vm13, %vm240_vm12  ;;  %v259_v33 = vand.u32 2147483648, %v233_v50  ;;  %vm253_vm5 = vweird.f32 %v233_v50 }
 0x468   :  { %v783_v1 = vmul.f32 %v779_v0, %v729_v61  ;;  %v236_v47 = vsub.f32 1.0, %v235_v8  ;;  %1106 = vrcp.f32 %v1152_v51 }
 0x469   :  { %v260_v35 = vor.u32 1.1754944e-38, %v259_v33 }
 0x46a   :  { %804 = vrot.lane.b32.xlu0 %v783_v1, %s1151_s24  ;;  %v237_v9 = vmul.f32 %v1103_v7, %v236_v47 }
 0x46c   :  { %v238_v10 = vadd.f32 %v1103_v7, %v237_v9 }
 0x46d   :  { %v1105_v17 = vpop.eup %1104 }
 0x46e   :  { %v242_v13 = vsel %vm241_vm14, %v1103_v7, %v238_v10  ;;  %v249_v21 = vmul.f32 %v1105_v17, %v233_v50  ;;  %v795_v28 = vpop.permute.xlu2 %794  ;;  %vm254_vm4 = vweird.f32 %v1105_v17  ;;  %v1107_v52 = vpop.eup %1106 }
 0x46f   :  { %v247_v20 = vsel %vm244_vm15, %v246_v19, %v242_v13  ;;  %vm255_vm6 = vmor %vm253_vm5, %vm254_vm4  ;;  %v876_v53 = vmul.f32 32.0, %v1107_v52 }
 0x470   :  { %v314_v23 = vmul.f32 %v1360_v62, %v247_v20  ;;  %v250_v24 = vsub.f32 1.0, %v249_v21  ;;  %v257_v62 = vand.u32 2147483647, %v233_v50  ;;  %v1071_v21 = vld [vmem:[%s1480_s9] ss:$0 sm:$0xff] }
 0x471   :  { %v877_v54 = vsub.f32 1.0, %v876_v53 }
 0x472   :  { %v808_v18 = vsel %vm163_vm1, %v314_v23, %v787_v25  ;;  %v251_v27 = vmul.f32 %v1105_v17, %v250_v24  ;;  %vm258_vm7 = vcmp.eq.f32.partialorder %v257_v62, 8.507059e+37 }
 0x473   :  { %v811_v29 = vsel %vm810_vm2, %v808_v18, %v795_v28  ;;  %v878_v55 = vmul.f32 %v1107_v52, %v877_v54 }
 0x474   :  { %v252_v32 = vadd.f32 %v1105_v17, %v251_v27 }
 0x475   :  { %v879_v56 = vadd.f32 %v1107_v52, %v878_v55 }
 0x476   :  { %v256_v34 = vsel %vm255_vm6, %v1105_v17, %v252_v32  ;;  %v1070_v17 = vld [vmem:[%s1479_s8] ss:$0 sm:$0xff] }
 0x477   :  { %v261_v37 = vsel %vm258_vm7, %v260_v35, %v256_v34 }
 0x478   :  { %v315_v16 = vmul.f32 %v1362_v63, %v261_v37 }
 0x48f   :  { %v789_v36 = vpop.permute.xlu0 %788 }
 0x490   :  { %v809_v26 = vsel %vm163_vm1, %v315_v16, %v789_v36  ;;  %vm880_vm1 = vweird.f32 %v1107_v52 }
 0x491   :  { %v1437_v57 = vsel %vm880_vm1, %v1107_v52, %v879_v56 }
 0x4bc   :  { %v797_v22 = vpop.permute.xlu2 %796 }
 0x4bd   :  { %v812_v38 = vsel %vm810_vm2, %v809_v26, %v797_v22 }
 0x4cc   :  { %v803_v30 = vpop.permute.xlu1 %802 }
 0x4cd   :  { %v814_v31 = vsel %vm813_vm3, %v811_v29, %v803_v30 }
 0x4ce   :  { %1052 = vmatmul.msk.f32.vlgmr.msra.gmra.mxu2 %vm54_vm0, %v814_v31 }
 0x4dc   :  { %v805_v39 = vpop.permute.xlu0 %804 }
 0x4dd   :  { %v815_v40 = vsel %vm813_vm3, %v812_v38, %v805_v39 }
 0x4de   :  { %1053 = vmatmul.msk.f32.gmra.mxu2 %vm54_vm0, %v815_v40 }
 0x551   :  { %v859_v42 = vpop.f32.mrf.mxu2 }
 0x552   :  { %v860_v43 = vadd.f32 %v1069_v41, %v859_v42 }
 0x554   :  { %v865_v44 = vadd.f32 %v860_v43, %v1279_v14 }
 0x556   :  { %v869_v63 = vsel %vm54_vm0, %v865_v44, 0.0 }
 0x557   :  { %870 = vadd.xlane.f32.xlu1 %v869_v63 }
 0x561   :  { %v862_v45 = vpop.f32.mrf.mxu2 }
 0x562   :  { %v863_v46 = vadd.f32 %v1069_v41, %v862_v45 }
 0x564   :  { %v866_v48 = vadd.f32 %v863_v46, %v1286_v15 }
 0x566   :  { %v872_v49 = vsel %vm54_vm0, %v866_v48, 0.0 }
 0x567   :  { %873 = vadd.xlane.f32.xlu2 %v872_v49 }
 0x5ca   :  { %v871_v14 = vpop.xlane.xlu1 %870 }
 0x5cb   :  { %v882_v58 = vmul.f32 %v1437_v57, %v871_v14 }
 0x5cd   :  { %v884_v59 = vsub.f32 %v865_v44, %v882_v58  ;;  %v1072_v58 = vld [vmem:[%s1481_s10] ss:$0 sm:$0xff]  ;;  %s1153_s10 = smov [#allocation2]  }
 0x5ce   :  { %s994_s18 = sshll.u32 %s1153_s10, 4  ;;  %s995_s18 = int_to_ptr.vmem [resolvable:$true] %s994_s18 }
 0x5cf   :  { %v886_v60 = vmul.f32 %v884_v59, %v884_v59 }
 0x5d1   :  { %v888_v15 = vsel %vm54_vm0, %v886_v60, 0.0 }
 0x5d2   :  { %889 = vadd.xlane.f32.xlu0 %v888_v15  ;;  %v1073_v15 = vld [vmem:[%s1482_s11] ss:$0 sm:$0xff]  ;;  %s996_s11 = sshll.u32 %s1483_s12, 4  ;;  %s997_s11 = int_to_ptr.hbm [resolvable:$true] %s996_s11 }
 0x5da   :  { %v874_v61 = vpop.xlane.xlu2 %873 }
 0x5db   :  { %v883_v0 = vmul.f32 %v1437_v57, %v874_v61 }
 0x5dd   :  { %v885_v1 = vsub.f32 %v866_v48, %v883_v0 }
 0x5df   :  { %v887_v2 = vmul.f32 %v885_v1, %v885_v1 }
 0x5e1   :  { %v891_v3 = vsel %vm54_vm0, %v887_v2, 0.0 }
 0x5e2   :  { %892 = vadd.xlane.f32.xlu1 %v891_v3 }
 0x645   :  { %v890_v4 = vpop.xlane.xlu0 %889 }
 0x646   :  { %v894_v5 = vmul.f32 %v890_v4, %v1437_v57 }
 0x648   :  { %v896_v6 = vadd.f32 1e-05, %v894_v5 }
 0x64a   :  { %1108 = vrsqrt.f32 %v896_v6  ;;  %vm904_vm9 = vweird.f32 %v896_v6 }
 0x650   :  { %v1109_v7 = vpop.eup %1108 }
 0x651   :  { %v899_v8 = vmul.f32 %v1109_v7, %v896_v6  ;;  %vm905_vm8 = vweird.f32 %v1109_v7 }
 0x652   :  { %vm906_vm10 = vmor %vm904_vm9, %vm905_vm8 }
 0x653   :  { %v900_v47 = vmul.f32 %v1109_v7, %v899_v8 }
 0x655   :  { %v901_v9 = vmul.f32 0.5, %v900_v47  ;;  %v893_v50 = vpop.xlane.xlu1 %892 }
 0x656   :  { %v895_v10 = vmul.f32 %v893_v50, %v1437_v57 }
 0x657   :  { %v902_v11 = vsub.f32 1.5, %v901_v9 }
 0x658   :  { %v897_v12 = vadd.f32 1e-05, %v895_v10 }
 0x659   :  { %v903_v13 = vmul.f32 %v1109_v7, %v902_v11 }
 0x65a   :  { %1110 = vrsqrt.f32 %v897_v12  ;;  %vm914_vm12 = vweird.f32 %v897_v12 }
 0x65b   :  { %v907_v19 = vsel %vm906_vm10, %v1109_v7, %v903_v13 }
 0x65c   :  { %v918_v20 = vmul.f32 %v907_v19, %v884_v59 }
 0x65e   :  { %v923_v23 = vmul.f32 %v1070_v17, %v918_v20 }
 0x660   :  { %v1111_v24 = vpop.eup %1110  ;;  %v928_v25 = vadd.f32 %v1071_v21, %v923_v23 }
 0x661   :  { %v909_v18 = vmul.f32 %v1111_v24, %v897_v12  ;;  %vm915_vm11 = vweird.f32 %v1111_v24 }
 0x662   :  { %v930_v27 = vadd.f32 %v928_v25, %v928_v25  ;;  %vm916_vm13 = vmor %vm914_vm12, %vm915_vm11 }
 0x663   :  { %v910_v28 = vmul.f32 %v1111_v24, %v909_v18 }
 0x664   :  { %v934_v29 = vsel %vm54_vm0, %v930_v27, 0.0 }
 0x665   :  { %v911_v30 = vmul.f32 0.5, %v910_v28  ;;  %935 = vadd.xlane.f32.xlu2 %v934_v29 }
 0x667   :  { %v912_v31 = vsub.f32 1.5, %v911_v30 }
 0x669   :  { %v913_v32 = vmul.f32 %v1111_v24, %v912_v31 }
 0x66b   :  { %v917_v33 = vsel %vm916_vm13, %v1111_v24, %v913_v32 }
 0x66c   :  { %v919_v62 = vmul.f32 %v917_v33, %v885_v1 }
 0x66e   :  { %v924_v34 = vmul.f32 %v1070_v17, %v919_v62 }
 0x670   :  { %v929_v35 = vadd.f32 %v1071_v21, %v924_v34 }
 0x672   :  { %v931_v36 = vadd.f32 %v929_v35, %v929_v35 }
 0x674   :  { %v937_v37 = vsel %vm54_vm0, %v931_v36, 0.0 }
 0x675   :  { %938 = vadd.xlane.f32.xlu0 %v937_v37 }
 0x6d8   :  { %v936_v16 = vpop.xlane.xlu2 %935 }
 0x6d9   :  { %v940_v22 = vmul.f32 %v936_v16, %v1437_v57 }
 0x6db   :  { %v942_v26 = vsub.f32 %v930_v27, %v940_v22 }
 0x6dd   :  { %v944_v38 = vmul.f32 %v942_v26, %v942_v26 }
 0x6df   :  { %v946_v39 = vsel %vm54_vm0, %v944_v38, 0.0 }
 0x6e0   :  { %947 = vadd.xlane.f32.xlu1 %v946_v39 }
 0x6e8   :  { %v939_v40 = vpop.xlane.xlu0 %938 }
 0x6e9   :  { %v941_v41 = vmul.f32 %v939_v40, %v1437_v57 }
 0x6eb   :  { %v943_v42 = vsub.f32 %v931_v36, %v941_v41 }
 0x6ed   :  { %v945_v43 = vmul.f32 %v943_v42, %v943_v42 }
 0x6ef   :  { %v949_v44 = vsel %vm54_vm0, %v945_v43, 0.0 }
 0x6f0   :  { %950 = vadd.xlane.f32.xlu2 %v949_v44 }
 0x753   :  { %v948_v63 = vpop.xlane.xlu1 %947 }
 0x754   :  { %v952_v45 = vmul.f32 %v948_v63, %v1437_v57 }
 0x756   :  { %v954_v46 = vadd.f32 1e-05, %v952_v45 }
 0x758   :  { %1112 = vrsqrt.f32 %v954_v46  ;;  %vm962_vm15 = vweird.f32 %v954_v46 }
 0x75e   :  { %v1113_v48 = vpop.eup %1112 }
 0x75f   :  { %v957_v49 = vmul.f32 %v1113_v48, %v954_v46  ;;  %vm963_vm14 = vweird.f32 %v1113_v48 }
 0x760   :  { %vm964_vm2 = vmor %vm962_vm15, %vm963_vm14 }
 0x761   :  { %v958_v51 = vmul.f32 %v1113_v48, %v957_v49 }
 0x763   :  { %v959_v52 = vmul.f32 0.5, %v958_v51  ;;  %v951_v53 = vpop.xlane.xlu2 %950 }
 0x764   :  { %v953_v54 = vmul.f32 %v951_v53, %v1437_v57 }
 0x765   :  { %v960_v55 = vsub.f32 1.5, %v959_v52 }
 0x766   :  { %v955_v56 = vadd.f32 1e-05, %v953_v54 }
 0x767   :  { %v961_v14 = vmul.f32 %v1113_v48, %v960_v55 }
 0x768   :  { %1114 = vrsqrt.f32 %v955_v56  ;;  %vm972_vm4 = vweird.f32 %v955_v56 }
 0x769   :  { %v965_v59 = vsel %vm964_vm2, %v1113_v48, %v961_v14 }
 0x76a   :  { %v976_v60 = vmul.f32 %v965_v59, %v942_v26 }
 0x76c   :  { %v981_v61 = vmul.f32 %v1072_v58, %v976_v60 }
 0x76e   :  { %v1115_v0 = vpop.eup %1114  ;;  %v986_v57 = vadd.f32 %v1073_v15, %v981_v61 }
 0x76f   :  { %v967_v1 = vmul.f32 %v1115_v0, %v955_v56  ;;  %vm973_vm3 = vweird.f32 %v1115_v0 }
 0x770   :  { %988 = vst.msk [vmem:[#allocation2] sm:$0xff] %vm54_vm0, %v986_v57  ;;  %vm974_vm5 = vmor %vm972_vm4, %vm973_vm3 }
 0x771   :  { %v968_v2 = vmul.f32 %v1115_v0, %v967_v1 }
 0x773   :  { %v969_v3 = vmul.f32 0.5, %v968_v2 }
 0x775   :  { %v970_v4 = vsub.f32 1.5, %v969_v3 }
 0x777   :  { %v971_v5 = vmul.f32 %v1115_v0, %v970_v4 }
 0x779   :  { %v975_v6 = vsel %vm974_vm5, %v1115_v0, %v971_v5 }
 0x77a   :  { %v977_v7 = vmul.f32 %v975_v6, %v943_v42 }
 0x77c   :  { %v982_v8 = vmul.f32 %v1072_v58, %v977_v7 }
 0x77e   :  { %v987_v47 = vadd.f32 %v1073_v15, %v982_v8 }
 0x780   :  { %989 = vst.msk [vmem:[#allocation2 + $0x8] sm:$0xff] %vm54_vm0, %v987_v47 }
 0x781   :  { %1002 = dma.vmem_to_hbm [thread:$0]  %s995_s18, 256, %s997_s11, [#allocation3], %s1154_s5, %s1154_s5, %s1149_s22  }
 0x782   :  { %1140 = dma.done.wait [#allocation3], 256  }
 0x783   :  { %1141 = vsyncadd [#allocation3], 4294967040 }
 0x784   :  { %1007 = vsyncpa [#allocation3], 1 }

</bundles_post_ra>
